<compile_context>
chip_gen: v6e
topology: v6e:2x2x1
jax: 0.10.0
libtpu: 0.0.40
codegen_flags: <defaults>
</compile_context>

<pallas_src>
import math

import jax
import jax.numpy as jnp
import numpy as np
from jax import lax
from jax.experimental import pallas as pl
from jax.experimental.pallas import tpu as pltpu


# ---------------------------------------------------------------------------
# Bilinear resize with PyTorch F.interpolate semantics (align_corners=False).
# ---------------------------------------------------------------------------
def _bilinear_coords(in_size, out_size):
    scale = in_size / out_size
    dst = jnp.arange(out_size, dtype=jnp.float32)
    src = scale * (dst + 0.5) - 0.5
    src = jnp.maximum(src, 0.0)                      # PyTorch clamps negative coords
    i0 = jnp.clip(jnp.floor(src).astype(jnp.int32), 0, in_size - 1)
    i1 = jnp.clip(i0 + 1, 0, in_size - 1)
    w1 = src - i0.astype(jnp.float32)
    w0 = 1.0 - w1
    return i0, i1, w0, w1


def bilinear_resize_nchw(x, out_h, out_w):
    """x: (N, C, H, W) f32 -> (N, C, out_h, out_w) f32."""
    _, _, H, W = x.shape
    h0, h1, wh0, wh1 = _bilinear_coords(H, out_h)
    v0, v1, wv0, wv1 = _bilinear_coords(W, out_w)
    xh = (x[:, :, h0, :] * wh0[None, None, :, None]
          + x[:, :, h1, :] * wh1[None, None, :, None])          # (N, C, out_h, W)
    out = (xh[:, :, :, v0] * wv0[None, None, None, :]
           + xh[:, :, :, v1] * wv1[None, None, None, :])         # (N, C, out_h, out_w)
    return out


def _round_up(v, m):
    return (v + m - 1) // m * m


def _pick_tile(hs, max_tile):
    """Largest tile <= max_tile that divides hs (exact blocks, no ragged tile)."""
    t = min(hs, max_tile)
    while hs % t != 0:
        t -= 1
    return max(t, 1)


# ---------------------------------------------------------------------------
# Pallas kernel: 3x3 "same" conv, one lane-dense MXU contraction per output row.
# ---------------------------------------------------------------------------
def _conv3x3_kernel(x_hbm, w_ref, b_ref, o_ref, xbuf, sem):
    # Shapes seen by the kernel:
    #   x_hbm : (N, Hs+2, Cin_p, Ws+2)  raw HBM ref (memory_space=pl.ANY)
    #   w_ref : (Cout, 9*Cin_p)         folded conv weights (MXU dtype)
    #   b_ref : (Cout, 1)               bias, f32
    #   o_ref : (1, TH, Cout, Ws)       output tile (f32), row-major H outside
    #   xbuf  : (TH+2, Cin_p, Ws+2)     VMEM halo-window scratch (MXU dtype)
    n = pl.program_id(0)
    t = pl.program_id(1)
    th = o_ref.shape[1]
    cout = o_ref.shape[2]
    ws = o_ref.shape[3]

    # Manual halo DMA: padded rows [t*TH, t*TH + TH + 2) of batch element n.
    cp = pltpu.make_async_copy(x_hbm.at[n, pl.ds(t * th, th + 2)], xbuf, sem)
    cp.start()

    w_mat = w_ref[...]                                        # (Cout, 9*Cin_p)
    bias = jnp.broadcast_to(b_ref[...], (cout, ws))           # hoisted once per tile

    cp.wait()

    def row_body(i, carry):
        # kh-fold: stack the three padded input rows on sublanes -> (3*Cin_p, Ws+2).
        # Each xbuf[i+kh] is a tile-aligned (Cin_p, Ws+2) slab (dynamic index on an
        # untiled outer dim), and Cin_p % 8 == 0 keeps the concat sublane-aligned.
        xr = jnp.concatenate(
            [xbuf[i].astype(jnp.float32),
             xbuf[i + 1].astype(jnp.float32),
             xbuf[i + 2].astype(jnp.float32)], axis=0)
        # kw-fold: three lane-shifted windows -> im2col row block (9*Cin_p, Ws).
        patch = jnp.concatenate(
            [xr[:, 0:ws], xr[:, 1:1 + ws], xr[:, 2:2 + ws]], axis=0)
        # Single lane-dense MXU contraction: (Cout, 9*Cin_p) @ (9*Cin_p, Ws),
        # bf16 inputs, f32 accumulation, f32 epilogue.
        y = jnp.dot(w_mat, patch.astype(w_mat.dtype),
                    preferred_element_type=jnp.float32) + bias
        o_ref[0, i] = y.astype(o_ref.dtype)
        return carry

    lax.fori_loop(0, th, row_body, 0, unroll=True)


def conv3x3_same_pallas(xd, w_oihw, b, *, tile_h=32, mxu_dtype=jnp.bfloat16):
    """xd: (N, Cin, Hs, Ws) f32, w_oihw: (Cout, Cin, 3, 3), b: (Cout,).
       Returns (N, Cout, Hs, Ws) f32 = Conv2d(kernel=3, stride=1, padding=1)."""
    N, Cin, Hs, Ws = xd.shape
    Cout = w_oihw.shape[0]
    cin_p = _round_up(Cin, 8)              # sublane-align channels (zero pad)
    Hp, Wp = Hs + 2, Ws + 2

    # Activation layout (N, H, Cin_p, W): each padded row group is a tile-aligned
    # (Cin_p, Wp) 2-D slab, stored in bf16 to halve HBM/VMEM traffic.
    xrow = jnp.transpose(xd, (0, 2, 1, 3))                              # (N, Hs, Cin, Ws)
    xpad = jnp.pad(xrow, ((0, 0), (1, 1), (0, cin_p - Cin), (1, 1)))
    xpad = xpad.astype(mxu_dtype)

    # Fold the 3x3 taps into one contraction: (Cout, 9*Cin_p), ordered kw-major,
    # then kh, then channel — matching the in-kernel patch row ordering.
    w_k = jnp.transpose(w_oihw, (0, 3, 2, 1))                           # (Cout, KW, KH, Cin)
    w_k = jnp.pad(w_k, ((0, 0), (0, 0), (0, 0), (0, cin_p - Cin)))
    w_mat = w_k.reshape(Cout, 9 * cin_p).astype(mxu_dtype)
    b_col = b.reshape(Cout, 1).astype(jnp.float32)

    th = _pick_tile(Hs, tile_h)
    n_th = Hs // th

    grid_spec = pltpu.PrefetchScalarGridSpec(
        num_scalar_prefetch=0,
        grid=(N, n_th),
        in_specs=[
            pl.BlockSpec(memory_space=pl.ANY),                          # activations stay in HBM
            pl.BlockSpec((Cout, 9 * cin_p), lambda n, t: (0, 0)),       # folded weights
            pl.BlockSpec((Cout, 1), lambda n, t: (0, 0)),               # bias
        ],
        out_specs=pl.BlockSpec((1, th, Cout, Ws), lambda n, t: (n, t, 0, 0)),
        scratch_shapes=[
            pltpu.VMEM((th + 2, cin_p, Wp), mxu_dtype),                 # halo window
            pltpu.SemaphoreType.DMA,
        ],
    )
    y = pl.pallas_call(
        _conv3x3_kernel,
        out_shape=jax.ShapeDtypeStruct((N, Hs, Cout, Ws), jnp.float32),
        grid_spec=grid_spec,
        compiler_params=pltpu.CompilerParams(
            dimension_semantics=("parallel", "parallel")),
    )(xpad, w_mat, b_col)

    return jnp.transpose(y, (0, 2, 1, 3))                               # (N, Cout, Hs, Ws)


# ---------------------------------------------------------------------------
# PyramidalConv forward (NCHW in, NCHW out, matching the PyTorch module).
# ---------------------------------------------------------------------------
def pyramidal_conv(x_nchw, params, scales, *, tile_h=32, mxu_dtype=jnp.bfloat16):
    x = x_nchw.astype(jnp.float32)
    _, _, H, W = x.shape
    feats = []
    for s, (w_oihw, b) in zip(scales, params):
        hs = int(math.floor(H * (1.0 / s)))                    # floor(H * 1/scale)
        ws = int(math.floor(W * (1.0 / s)))
        xd = bilinear_resize_nchw(x, hs, ws)                   # downsample
        y = conv3x3_same_pallas(xd, w_oihw, b,
                                tile_h=tile_h, mxu_dtype=mxu_dtype)
        feats.append(bilinear_resize_nchw(y, H, W))            # upsample to input size
    # TODO(synk): the upsample + channel concat are separate HBM passes; fusing
    # them into the conv kernel epilogue / out_specs offsets would cut traffic.
    return jnp.concatenate(feats, axis=1)                      # (N, Cout*len(scales), H, W)


def pyramidal_conv_reference(x_nchw, params, scales, conv_dtype=jnp.float32):
    """Pure-JAX reference (lax conv) sharing the same resize code."""
    x = x_nchw.astype(jnp.float32)
    _, _, H, W = x.shape
    feats = []
    for s, (w_oihw, b) in zip(scales, params):
        hs = int(math.floor(H * (1.0 / s)))
        ws = int(math.floor(W * (1.0 / s)))
        xd = bilinear_resize_nchw(x, hs, ws)
        y = lax.conv_general_dilated(
            xd.astype(conv_dtype), w_oihw.astype(conv_dtype),
            window_strides=(1, 1), padding="SAME",
            dimension_numbers=("NCHW", "OIHW", "NCHW"),
            preferred_element_type=jnp.float32)
        y = y + b[None, :, None, None].astype(jnp.float32)
        feats.append(bilinear_resize_nchw(y, H, W))
    return jnp.concatenate(feats, axis=1)


if __name__ == "__main__":
    key = jax.random.PRNGKey(0)
    N, Cin, H, W = 2, 4, 16, 16
    Cout = 8
    scales = [1, 2, 4]

    keys = jax.random.split(key, 1 + 2 * len(scales))
    x_nchw = jax.random.normal(keys[0], (N, Cin, H, W), dtype=jnp.float32)

    params = []
    for i in range(len(scales)):
        w_oihw = jax.random.normal(keys[1 + 2 * i], (Cout, Cin, 3, 3),
                                   dtype=jnp.float32) * 0.1
        b = jax.random.normal(keys[2 + 2 * i], (Cout,), dtype=jnp.float32) * 0.1
        params.append((w_oihw, b))

    # Small tile_h exercises the multi-H-tile (halo DMA) path at these tiny shapes.
    out = pyramidal_conv(x_nchw, params, scales, tile_h=8)
    out = jax.block_until_ready(out)
    assert out.shape == (N, Cout * len(scales), H, W), out.shape

    # Matched-precision reference (same bf16 MXU inputs, f32 accumulation).
    ref_bf16 = pyramidal_conv_reference(x_nchw, params, scales,
                                        conv_dtype=jnp.bfloat16)
    np.testing.assert_allclose(np.asarray(out), np.asarray(ref_bf16),
                               rtol=2e-3, atol=2e-3)
    # Full-f32 reference: only bf16 input quantization error remains.
    ref_f32 = pyramidal_conv_reference(x_nchw, params, scales,
                                       conv_dtype=jnp.float32)
    np.testing.assert_allclose(np.asarray(out), np.asarray(ref_f32),
                               rtol=3e-2, atol=3e-2)

    # Default tile size (single H tile per scale at these shapes).
    out_default = jax.block_until_ready(pyramidal_conv(x_nchw, params, scales))
    np.testing.assert_allclose(np.asarray(out_default), np.asarray(ref_bf16),
                               rtol=2e-3, atol=2e-3)

    print("KERNEL_OK")
</pallas_src>

<mosaic_0001>
module attributes {stable_mosaic.version = 11 : i64} {
  func.func @_conv3x3_kernel(%arg0: i32, %arg1: i32, %arg2: memref<2x18x8x18xbf16, #tpu.memory_space<any>>, %arg3: memref<8x72xbf16, #tpu.memory_space<vmem>>, %arg4: memref<8x1xf32, #tpu.memory_space<vmem>>, %arg5: memref<1x8x8x16xf32, #tpu.memory_space<vmem>>, %arg6: memref<10x8x18xbf16, #tpu.memory_space<vmem>>, %arg7: memref<!tpu.dma_semaphore, #tpu.memory_space<semaphore_mem>>) attributes {dimension_semantics = [#tpu.dimension_semantics<parallel>, #tpu.dimension_semantics<parallel>], iteration_bounds = array<i64: 2, 2>, scalar_prefetch = 0 : i64, scratch_operands = 2 : i64, tpu.core_type = #tpu.core_type<tc>, window_params = [{}, {pipeline_mode = #tpu.pipeline_mode<synchronous>, transform_indices = @transform_1, window_bounds = array<i64: 8, 72>}, {pipeline_mode = #tpu.pipeline_mode<synchronous>, transform_indices = @transform_2, window_bounds = array<i64: 8, 1>}, {transform_indices = @transform_3, window_bounds = array<i64: 1, 8, 8, 16>}]} {
    %c8_i32 = arith.constant 8 : i32
    %0 = arith.muli %arg1, %c8_i32 : i32
    %c0_i32 = arith.constant 0 : i32
    %c0_i32_0 = arith.constant 0 : i32
    %1 = tpu.memref_slice %arg2[%arg0, %0, %c0_i32, %c0_i32_0] : memref<2x18x8x18xbf16, #tpu.memory_space<any>> -> memref<1x10x8x18xbf16, #tpu.memory_space<any>>
    %2 = tpu.memref_squeeze %1 : memref<1x10x8x18xbf16, #tpu.memory_space<any>> -> memref<10x8x18xbf16, #tpu.memory_space<any>>
    tpu.enqueue_dma source(%2 : memref<10x8x18xbf16, #tpu.memory_space<any>>) target(%arg6 : memref<10x8x18xbf16, #tpu.memory_space<vmem>>) target_semaphore(%arg7 : memref<!tpu.dma_semaphore, #tpu.memory_space<semaphore_mem>>)
    %c0 = arith.constant 0 : index
    %c0_1 = arith.constant 0 : index
    %3 = vector.load %arg3[%c0, %c0_1] : memref<8x72xbf16, #tpu.memory_space<vmem>>, vector<8x72xbf16>
    %c0_2 = arith.constant 0 : index
    %c0_3 = arith.constant 0 : index
    %4 = vector.load %arg4[%c0_2, %c0_3] : memref<8x1xf32, #tpu.memory_space<vmem>>, vector<8x1xf32>
    %5 = vector.shape_cast %4 : vector<8x1xf32> to vector<8x1xf32>
    %6 = vector.broadcast %5 : vector<8x1xf32> to vector<8x16xf32>
    %c0_i32_4 = arith.constant 0 : i32
    %c0_i32_5 = arith.constant 0 : i32
    %7 = tpu.memref_slice %arg2[%arg0, %0, %c0_i32_4, %c0_i32_5] : memref<2x18x8x18xbf16, #tpu.memory_space<any>> -> memref<1x10x8x18xbf16, #tpu.memory_space<any>>
    %8 = tpu.memref_squeeze %7 : memref<1x10x8x18xbf16, #tpu.memory_space<any>> -> memref<10x8x18xbf16, #tpu.memory_space<any>>
    tpu.wait_dma2 semaphore(%arg7 : memref<!tpu.dma_semaphore, #tpu.memory_space<semaphore_mem>>) src(%8 : memref<10x8x18xbf16, #tpu.memory_space<any>>) dst(%arg6 : memref<10x8x18xbf16, #tpu.memory_space<vmem>>)
    %c0_i32_6 = arith.constant 0 : i32
    %9 = arith.index_cast %c0_i32_6 : i32 to index
    %c0_7 = arith.constant 0 : index
    %c0_8 = arith.constant 0 : index
    %10 = vector.load %arg6[%9, %c0_7, %c0_8] : memref<10x8x18xbf16, #tpu.memory_space<vmem>>, vector<1x8x18xbf16>
    %11 = vector.shape_cast %10 : vector<1x8x18xbf16> to vector<8x18xbf16>
    %12 = arith.extf %11 : vector<8x18xbf16> to vector<8x18xf32>
    %c1_i32 = arith.constant 1 : i32
    %13 = arith.addi %c0_i32_6, %c1_i32 : i32
    %14 = arith.index_cast %13 : i32 to index
    %c0_9 = arith.constant 0 : index
    %c0_10 = arith.constant 0 : index
    %15 = vector.load %arg6[%14, %c0_9, %c0_10] : memref<10x8x18xbf16, #tpu.memory_space<vmem>>, vector<1x8x18xbf16>
    %16 = vector.shape_cast %15 : vector<1x8x18xbf16> to vector<8x18xbf16>
    %17 = arith.extf %16 : vector<8x18xbf16> to vector<8x18xf32>
    %c2_i32 = arith.constant 2 : i32
    %18 = arith.addi %c0_i32_6, %c2_i32 : i32
    %19 = arith.index_cast %18 : i32 to index
    %c0_11 = arith.constant 0 : index
    %c0_12 = arith.constant 0 : index
    %20 = vector.load %arg6[%19, %c0_11, %c0_12] : memref<10x8x18xbf16, #tpu.memory_space<vmem>>, vector<1x8x18xbf16>
    %21 = vector.shape_cast %20 : vector<1x8x18xbf16> to vector<8x18xbf16>
    %22 = arith.extf %21 : vector<8x18xbf16> to vector<8x18xf32>
    %23 = tpu.concatenate %12, %17, %22 in 0 : vector<8x18xf32>, vector<8x18xf32>, vector<8x18xf32> -> vector<24x18xf32>
    %24 = vector.extract_strided_slice %23 {offsets = [0, 0], sizes = [24, 16], strides = [1, 1]} : vector<24x18xf32> to vector<24x16xf32>
    %25 = vector.extract_strided_slice %23 {offsets = [0, 1], sizes = [24, 16], strides = [1, 1]} : vector<24x18xf32> to vector<24x16xf32>
    %26 = vector.extract_strided_slice %23 {offsets = [0, 2], sizes = [24, 16], strides = [1, 1]} : vector<24x18xf32> to vector<24x16xf32>
    %27 = tpu.concatenate %24, %25, %26 in 0 : vector<24x16xf32>, vector<24x16xf32>, vector<24x16xf32> -> vector<72x16xf32>
    %28 = arith.truncf %27 : vector<72x16xf32> to vector<72x16xbf16>
    %cst = arith.constant dense<0.000000e+00> : vector<8x16xf32>
    %29 = tpu.matmul %3, %28, %cst {dimension_numbers = #tpu.dot_dimension_numbers<[1], [0], [0], [1], [0, 0, 1, 1], [], []>} : vector<8x72xbf16>, vector<72x16xbf16>, vector<8x16xf32> -> vector<8x16xf32>
    %30 = arith.addf %29, %6 : vector<8x16xf32>
    %c0_13 = arith.constant 0 : index
    %31 = arith.index_cast %c0_i32_6 : i32 to index
    %c0_14 = arith.constant 0 : index
    %c0_15 = arith.constant 0 : index
    %32 = vector.load %arg5[%c0_13, %31, %c0_14, %c0_15] : memref<1x8x8x16xf32, #tpu.memory_space<vmem>>, vector<1x1x8x16xf32>
    %33 = vector.shape_cast %32 : vector<1x1x8x16xf32> to vector<8x16xf32>
    %34 = vector.shape_cast %30 : vector<8x16xf32> to vector<1x1x8x16xf32>
    tpu.vector_store %arg5[%c0_13, %31, %c0_14, %c0_15], %34 {strides = array<i32>} : memref<1x8x8x16xf32, #tpu.memory_space<vmem>>, vector<1x1x8x16xf32>,
    %c1_i32_16 = arith.constant 1 : i32
    %35 = arith.index_cast %c1_i32_16 : i32 to index
    %c0_17 = arith.constant 0 : index
    %c0_18 = arith.constant 0 : index
    %36 = vector.load %arg6[%35, %c0_17, %c0_18] : memref<10x8x18xbf16, #tpu.memory_space<vmem>>, vector<1x8x18xbf16>
    %37 = vector.shape_cast %36 : vector<1x8x18xbf16> to vector<8x18xbf16>
    %38 = arith.extf %37 : vector<8x18xbf16> to vector<8x18xf32>
    %c1_i32_19 = arith.constant 1 : i32
    %39 = arith.addi %c1_i32_16, %c1_i32_19 : i32
    %40 = arith.index_cast %39 : i32 to index
    %c0_20 = arith.constant 0 : index
    %c0_21 = arith.constant 0 : index
    %41 = vector.load %arg6[%40, %c0_20, %c0_21] : memref<10x8x18xbf16, #tpu.memory_space<vmem>>, vector<1x8x18xbf16>
    %42 = vector.shape_cast %41 : vector<1x8x18xbf16> to vector<8x18xbf16>
    %43 = arith.extf %42 : vector<8x18xbf16> to vector<8x18xf32>
    %c2_i32_22 = arith.constant 2 : i32
    %44 = arith.addi %c1_i32_16, %c2_i32_22 : i32
    %45 = arith.index_cast %44 : i32 to index
    %c0_23 = arith.constant 0 : index
    %c0_24 = arith.constant 0 : index
    %46 = vector.load %arg6[%45, %c0_23, %c0_24] : memref<10x8x18xbf16, #tpu.memory_space<vmem>>, vector<1x8x18xbf16>
    %47 = vector.shape_cast %46 : vector<1x8x18xbf16> to vector<8x18xbf16>
    %48 = arith.extf %47 : vector<8x18xbf16> to vector<8x18xf32>
    %49 = tpu.concatenate %38, %43, %48 in 0 : vector<8x18xf32>, vector<8x18xf32>, vector<8x18xf32> -> vector<24x18xf32>
    %50 = vector.extract_strided_slice %49 {offsets = [0, 0], sizes = [24, 16], strides = [1, 1]} : vector<24x18xf32> to vector<24x16xf32>
    %51 = vector.extract_strided_slice %49 {offsets = [0, 1], sizes = [24, 16], strides = [1, 1]} : vector<24x18xf32> to vector<24x16xf32>
    %52 = vector.extract_strided_slice %49 {offsets = [0, 2], sizes = [24, 16], strides = [1, 1]} : vector<24x18xf32> to vector<24x16xf32>
    %53 = tpu.concatenate %50, %51, %52 in 0 : vector<24x16xf32>, vector<24x16xf32>, vector<24x16xf32> -> vector<72x16xf32>
    %54 = arith.truncf %53 : vector<72x16xf32> to vector<72x16xbf16>
    %cst_25 = arith.constant dense<0.000000e+00> : vector<8x16xf32>
    %55 = tpu.matmul %3, %54, %cst_25 {dimension_numbers = #tpu.dot_dimension_numbers<[1], [0], [0], [1], [0, 0, 1, 1], [], []>} : vector<8x72xbf16>, vector<72x16xbf16>, vector<8x16xf32> -> vector<8x16xf32>
    %56 = arith.addf %55, %6 : vector<8x16xf32>
    %c0_26 = arith.constant 0 : index
    %57 = arith.index_cast %c1_i32_16 : i32 to index
    %c0_27 = arith.constant 0 : index
    %c0_28 = arith.constant 0 : index
    %58 = vector.load %arg5[%c0_26, %57, %c0_27, %c0_28] : memref<1x8x8x16xf32, #tpu.memory_space<vmem>>, vector<1x1x8x16xf32>
    %59 = vector.shape_cast %58 : vector<1x1x8x16xf32> to vector<8x16xf32>
    %60 = vector.shape_cast %56 : vector<8x16xf32> to vector<1x1x8x16xf32>
    tpu.vector_store %arg5[%c0_26, %57, %c0_27, %c0_28], %60 {strides = array<i32>} : memref<1x8x8x16xf32, #tpu.memory_space<vmem>>, vector<1x1x8x16xf32>,
    %c2_i32_29 = arith.constant 2 : i32
    %61 = arith.index_cast %c2_i32_29 : i32 to index
    %c0_30 = arith.constant 0 : index
    %c0_31 = arith.constant 0 : index
    %62 = vector.load %arg6[%61, %c0_30, %c0_31] : memref<10x8x18xbf16, #tpu.memory_space<vmem>>, vector<1x8x18xbf16>
    %63 = vector.shape_cast %62 : vector<1x8x18xbf16> to vector<8x18xbf16>
    %64 = arith.extf %63 : vector<8x18xbf16> to vector<8x18xf32>
    %c1_i32_32 = arith.constant 1 : i32
    %65 = arith.addi %c2_i32_29, %c1_i32_32 : i32
    %66 = arith.index_cast %65 : i32 to index
    %c0_33 = arith.constant 0 : index
    %c0_34 = arith.constant 0 : index
    %67 = vector.load %arg6[%66, %c0_33, %c0_34] : memref<10x8x18xbf16, #tpu.memory_space<vmem>>, vector<1x8x18xbf16>
    %68 = vector.shape_cast %67 : vector<1x8x18xbf16> to vector<8x18xbf16>
    %69 = arith.extf %68 : vector<8x18xbf16> to vector<8x18xf32>
    %c2_i32_35 = arith.constant 2 : i32
    %70 = arith.addi %c2_i32_29, %c2_i32_35 : i32
    %71 = arith.index_cast %70 : i32 to index
    %c0_36 = arith.constant 0 : index
    %c0_37 = arith.constant 0 : index
    %72 = vector.load %arg6[%71, %c0_36, %c0_37] : memref<10x8x18xbf16, #tpu.memory_space<vmem>>, vector<1x8x18xbf16>
    %73 = vector.shape_cast %72 : vector<1x8x18xbf16> to vector<8x18xbf16>
    %74 = arith.extf %73 : vector<8x18xbf16> to vector<8x18xf32>
    %75 = tpu.concatenate %64, %69, %74 in 0 : vector<8x18xf32>, vector<8x18xf32>, vector<8x18xf32> -> vector<24x18xf32>
    %76 = vector.extract_strided_slice %75 {offsets = [0, 0], sizes = [24, 16], strides = [1, 1]} : vector<24x18xf32> to vector<24x16xf32>
    %77 = vector.extract_strided_slice %75 {offsets = [0, 1], sizes = [24, 16], strides = [1, 1]} : vector<24x18xf32> to vector<24x16xf32>
    %78 = vector.extract_strided_slice %75 {offsets = [0, 2], sizes = [24, 16], strides = [1, 1]} : vector<24x18xf32> to vector<24x16xf32>
    %79 = tpu.concatenate %76, %77, %78 in 0 : vector<24x16xf32>, vector<24x16xf32>, vector<24x16xf32> -> vector<72x16xf32>
    %80 = arith.truncf %79 : vector<72x16xf32> to vector<72x16xbf16>
    %cst_38 = arith.constant dense<0.000000e+00> : vector<8x16xf32>
    %81 = tpu.matmul %3, %80, %cst_38 {dimension_numbers = #tpu.dot_dimension_numbers<[1], [0], [0], [1], [0, 0, 1, 1], [], []>} : vector<8x72xbf16>, vector<72x16xbf16>, vector<8x16xf32> -> vector<8x16xf32>
    %82 = arith.addf %81, %6 : vector<8x16xf32>
    %c0_39 = arith.constant 0 : index
    %83 = arith.index_cast %c2_i32_29 : i32 to index
    %c0_40 = arith.constant 0 : index
    %c0_41 = arith.constant 0 : index
    %84 = vector.load %arg5[%c0_39, %83, %c0_40, %c0_41] : memref<1x8x8x16xf32, #tpu.memory_space<vmem>>, vector<1x1x8x16xf32>
    %85 = vector.shape_cast %84 : vector<1x1x8x16xf32> to vector<8x16xf32>
    %86 = vector.shape_cast %82 : vector<8x16xf32> to vector<1x1x8x16xf32>
    tpu.vector_store %arg5[%c0_39, %83, %c0_40, %c0_41], %86 {strides = array<i32>} : memref<1x8x8x16xf32, #tpu.memory_space<vmem>>, vector<1x1x8x16xf32>,
    %c3_i32 = arith.constant 3 : i32
    %87 = arith.index_cast %c3_i32 : i32 to index
    %c0_42 = arith.constant 0 : index
    %c0_43 = arith.constant 0 : index
    %88 = vector.load %arg6[%87, %c0_42, %c0_43] : memref<10x8x18xbf16, #tpu.memory_space<vmem>>, vector<1x8x18xbf16>
    %89 = vector.shape_cast %88 : vector<1x8x18xbf16> to vector<8x18xbf16>
    %90 = arith.extf %89 : vector<8x18xbf16> to vector<8x18xf32>
    %c1_i32_44 = arith.constant 1 : i32
    %91 = arith.addi %c3_i32, %c1_i32_44 : i32
    %92 = arith.index_cast %91 : i32 to index
    %c0_45 = arith.constant 0 : index
    %c0_46 = arith.constant 0 : index
    %93 = vector.load %arg6[%92, %c0_45, %c0_46] : memref<10x8x18xbf16, #tpu.memory_space<vmem>>, vector<1x8x18xbf16>
    %94 = vector.shape_cast %93 : vector<1x8x18xbf16> to vector<8x18xbf16>
    %95 = arith.extf %94 : vector<8x18xbf16> to vector<8x18xf32>
    %c2_i32_47 = arith.constant 2 : i32
    %96 = arith.addi %c3_i32, %c2_i32_47 : i32
    %97 = arith.index_cast %96 : i32 to index
    %c0_48 = arith.constant 0 : index
    %c0_49 = arith.constant 0 : index
    %98 = vector.load %arg6[%97, %c0_48, %c0_49] : memref<10x8x18xbf16, #tpu.memory_space<vmem>>, vector<1x8x18xbf16>
    %99 = vector.shape_cast %98 : vector<1x8x18xbf16> to vector<8x18xbf16>
    %100 = arith.extf %99 : vector<8x18xbf16> to vector<8x18xf32>
    %101 = tpu.concatenate %90, %95, %100 in 0 : vector<8x18xf32>, vector<8x18xf32>, vector<8x18xf32> -> vector<24x18xf32>
    %102 = vector.extract_strided_slice %101 {offsets = [0, 0], sizes = [24, 16], strides = [1, 1]} : vector<24x18xf32> to vector<24x16xf32>
    %103 = vector.extract_strided_slice %101 {offsets = [0, 1], sizes = [24, 16], strides = [1, 1]} : vector<24x18xf32> to vector<24x16xf32>
    %104 = vector.extract_strided_slice %101 {offsets = [0, 2], sizes = [24, 16], strides = [1, 1]} : vector<24x18xf32> to vector<24x16xf32>
    %105 = tpu.concatenate %102, %103, %104 in 0 : vector<24x16xf32>, vector<24x16xf32>, vector<24x16xf32> -> vector<72x16xf32>
    %106 = arith.truncf %105 : vector<72x16xf32> to vector<72x16xbf16>
    %cst_50 = arith.constant dense<0.000000e+00> : vector<8x16xf32>
    %107 = tpu.matmul %3, %106, %cst_50 {dimension_numbers = #tpu.dot_dimension_numbers<[1], [0], [0], [1], [0, 0, 1, 1], [], []>} : vector<8x72xbf16>, vector<72x16xbf16>, vector<8x16xf32> -> vector<8x16xf32>
    %108 = arith.addf %107, %6 : vector<8x16xf32>
    %c0_51 = arith.constant 0 : index
    %109 = arith.index_cast %c3_i32 : i32 to index
    %c0_52 = arith.constant 0 : index
    %c0_53 = arith.constant 0 : index
    %110 = vector.load %arg5[%c0_51, %109, %c0_52, %c0_53] : memref<1x8x8x16xf32, #tpu.memory_space<vmem>>, vector<1x1x8x16xf32>
    %111 = vector.shape_cast %110 : vector<1x1x8x16xf32> to vector<8x16xf32>
    %112 = vector.shape_cast %108 : vector<8x16xf32> to vector<1x1x8x16xf32>
    tpu.vector_store %arg5[%c0_51, %109, %c0_52, %c0_53], %112 {strides = array<i32>} : memref<1x8x8x16xf32, #tpu.memory_space<vmem>>, vector<1x1x8x16xf32>,
    %c4_i32 = arith.constant 4 : i32
    %113 = arith.index_cast %c4_i32 : i32 to index
    %c0_54 = arith.constant 0 : index
    %c0_55 = arith.constant 0 : index
    %114 = vector.load %arg6[%113, %c0_54, %c0_55] : memref<10x8x18xbf16, #tpu.memory_space<vmem>>, vector<1x8x18xbf16>
    %115 = vector.shape_cast %114 : vector<1x8x18xbf16> to vector<8x18xbf16>
    %116 = arith.extf %115 : vector<8x18xbf16> to vector<8x18xf32>
    %c1_i32_56 = arith.constant 1 : i32
    %117 = arith.addi %c4_i32, %c1_i32_56 : i32
    %118 = arith.index_cast %117 : i32 to index
    %c0_57 = arith.constant 0 : index
    %c0_58 = arith.constant 0 : index
    %119 = vector.load %arg6[%118, %c0_57, %c0_58] : memref<10x8x18xbf16, #tpu.memory_space<vmem>>, vector<1x8x18xbf16>
    %120 = vector.shape_cast %119 : vector<1x8x18xbf16> to vector<8x18xbf16>
    %121 = arith.extf %120 : vector<8x18xbf16> to vector<8x18xf32>
    %c2_i32_59 = arith.constant 2 : i32
    %122 = arith.addi %c4_i32, %c2_i32_59 : i32
    %123 = arith.index_cast %122 : i32 to index
    %c0_60 = arith.constant 0 : index
    %c0_61 = arith.constant 0 : index
    %124 = vector.load %arg6[%123, %c0_60, %c0_61] : memref<10x8x18xbf16, #tpu.memory_space<vmem>>, vector<1x8x18xbf16>
    %125 = vector.shape_cast %124 : vector<1x8x18xbf16> to vector<8x18xbf16>
    %126 = arith.extf %125 : vector<8x18xbf16> to vector<8x18xf32>
    %127 = tpu.concatenate %116, %121, %126 in 0 : vector<8x18xf32>, vector<8x18xf32>, vector<8x18xf32> -> vector<24x18xf32>
    %128 = vector.extract_strided_slice %127 {offsets = [0, 0], sizes = [24, 16], strides = [1, 1]} : vector<24x18xf32> to vector<24x16xf32>
    %129 = vector.extract_strided_slice %127 {offsets = [0, 1], sizes = [24, 16], strides = [1, 1]} : vector<24x18xf32> to vector<24x16xf32>
    %130 = vector.extract_strided_slice %127 {offsets = [0, 2], sizes = [24, 16], strides = [1, 1]} : vector<24x18xf32> to vector<24x16xf32>
    %131 = tpu.concatenate %128, %129, %130 in 0 : vector<24x16xf32>, vector<24x16xf32>, vector<24x16xf32> -> vector<72x16xf32>
    %132 = arith.truncf %131 : vector<72x16xf32> to vector<72x16xbf16>
    %cst_62 = arith.constant dense<0.000000e+00> : vector<8x16xf32>
    %133 = tpu.matmul %3, %132, %cst_62 {dimension_numbers = #tpu.dot_dimension_numbers<[1], [0], [0], [1], [0, 0, 1, 1], [], []>} : vector<8x72xbf16>, vector<72x16xbf16>, vector<8x16xf32> -> vector<8x16xf32>
    %134 = arith.addf %133, %6 : vector<8x16xf32>
    %c0_63 = arith.constant 0 : index
    %135 = arith.index_cast %c4_i32 : i32 to index
    %c0_64 = arith.constant 0 : index
    %c0_65 = arith.constant 0 : index
    %136 = vector.load %arg5[%c0_63, %135, %c0_64, %c0_65] : memref<1x8x8x16xf32, #tpu.memory_space<vmem>>, vector<1x1x8x16xf32>
    %137 = vector.shape_cast %136 : vector<1x1x8x16xf32> to vector<8x16xf32>
    %138 = vector.shape_cast %134 : vector<8x16xf32> to vector<1x1x8x16xf32>
    tpu.vector_store %arg5[%c0_63, %135, %c0_64, %c0_65], %138 {strides = array<i32>} : memref<1x8x8x16xf32, #tpu.memory_space<vmem>>, vector<1x1x8x16xf32>,
    %c5_i32 = arith.constant 5 : i32
    %139 = arith.index_cast %c5_i32 : i32 to index
    %c0_66 = arith.constant 0 : index
    %c0_67 = arith.constant 0 : index
    %140 = vector.load %arg6[%139, %c0_66, %c0_67] : memref<10x8x18xbf16, #tpu.memory_space<vmem>>, vector<1x8x18xbf16>
    %141 = vector.shape_cast %140 : vector<1x8x18xbf16> to vector<8x18xbf16>
    %142 = arith.extf %141 : vector<8x18xbf16> to vector<8x18xf32>
    %c1_i32_68 = arith.constant 1 : i32
    %143 = arith.addi %c5_i32, %c1_i32_68 : i32
    %144 = arith.index_cast %143 : i32 to index
    %c0_69 = arith.constant 0 : index
    %c0_70 = arith.constant 0 : index
    %145 = vector.load %arg6[%144, %c0_69, %c0_70] : memref<10x8x18xbf16, #tpu.memory_space<vmem>>, vector<1x8x18xbf16>
    %146 = vector.shape_cast %145 : vector<1x8x18xbf16> to vector<8x18xbf16>
    %147 = arith.extf %146 : vector<8x18xbf16> to vector<8x18xf32>
    %c2_i32_71 = arith.constant 2 : i32
    %148 = arith.addi %c5_i32, %c2_i32_71 : i32
    %149 = arith.index_cast %148 : i32 to index
    %c0_72 = arith.constant 0 : index
    %c0_73 = arith.constant 0 : index
    %150 = vector.load %arg6[%149, %c0_72, %c0_73] : memref<10x8x18xbf16, #tpu.memory_space<vmem>>, vector<1x8x18xbf16>
    %151 = vector.shape_cast %150 : vector<1x8x18xbf16> to vector<8x18xbf16>
    %152 = arith.extf %151 : vector<8x18xbf16> to vector<8x18xf32>
    %153 = tpu.concatenate %142, %147, %152 in 0 : vector<8x18xf32>, vector<8x18xf32>, vector<8x18xf32> -> vector<24x18xf32>
    %154 = vector.extract_strided_slice %153 {offsets = [0, 0], sizes = [24, 16], strides = [1, 1]} : vector<24x18xf32> to vector<24x16xf32>
    %155 = vector.extract_strided_slice %153 {offsets = [0, 1], sizes = [24, 16], strides = [1, 1]} : vector<24x18xf32> to vector<24x16xf32>
    %156 = vector.extract_strided_slice %153 {offsets = [0, 2], sizes = [24, 16], strides = [1, 1]} : vector<24x18xf32> to vector<24x16xf32>
    %157 = tpu.concatenate %154, %155, %156 in 0 : vector<24x16xf32>, vector<24x16xf32>, vector<24x16xf32> -> vector<72x16xf32>
    %158 = arith.truncf %157 : vector<72x16xf32> to vector<72x16xbf16>
    %cst_74 = arith.constant dense<0.000000e+00> : vector<8x16xf32>
    %159 = tpu.matmul %3, %158, %cst_74 {dimension_numbers = #tpu.dot_dimension_numbers<[1], [0], [0], [1], [0, 0, 1, 1], [], []>} : vector<8x72xbf16>, vector<72x16xbf16>, vector<8x16xf32> -> vector<8x16xf32>
    %160 = arith.addf %159, %6 : vector<8x16xf32>
    %c0_75 = arith.constant 0 : index
    %161 = arith.index_cast %c5_i32 : i32 to index
    %c0_76 = arith.constant 0 : index
    %c0_77 = arith.constant 0 : index
    %162 = vector.load %arg5[%c0_75, %161, %c0_76, %c0_77] : memref<1x8x8x16xf32, #tpu.memory_space<vmem>>, vector<1x1x8x16xf32>
    %163 = vector.shape_cast %162 : vector<1x1x8x16xf32> to vector<8x16xf32>
    %164 = vector.shape_cast %160 : vector<8x16xf32> to vector<1x1x8x16xf32>
    tpu.vector_store %arg5[%c0_75, %161, %c0_76, %c0_77], %164 {strides = array<i32>} : memref<1x8x8x16xf32, #tpu.memory_space<vmem>>, vector<1x1x8x16xf32>,
    %c6_i32 = arith.constant 6 : i32
    %165 = arith.index_cast %c6_i32 : i32 to index
    %c0_78 = arith.constant 0 : index
    %c0_79 = arith.constant 0 : index
    %166 = vector.load %arg6[%165, %c0_78, %c0_79] : memref<10x8x18xbf16, #tpu.memory_space<vmem>>, vector<1x8x18xbf16>
    %167 = vector.shape_cast %166 : vector<1x8x18xbf16> to vector<8x18xbf16>
    %168 = arith.extf %167 : vector<8x18xbf16> to vector<8x18xf32>
    %c1_i32_80 = arith.constant 1 : i32
    %169 = arith.addi %c6_i32, %c1_i32_80 : i32
    %170 = arith.index_cast %169 : i32 to index
    %c0_81 = arith.constant 0 : index
    %c0_82 = arith.constant 0 : index
    %171 = vector.load %arg6[%170, %c0_81, %c0_82] : memref<10x8x18xbf16, #tpu.memory_space<vmem>>, vector<1x8x18xbf16>
    %172 = vector.shape_cast %171 : vector<1x8x18xbf16> to vector<8x18xbf16>
    %173 = arith.extf %172 : vector<8x18xbf16> to vector<8x18xf32>
    %c2_i32_83 = arith.constant 2 : i32
    %174 = arith.addi %c6_i32, %c2_i32_83 : i32
    %175 = arith.index_cast %174 : i32 to index
    %c0_84 = arith.constant 0 : index
    %c0_85 = arith.constant 0 : index
    %176 = vector.load %arg6[%175, %c0_84, %c0_85] : memref<10x8x18xbf16, #tpu.memory_space<vmem>>, vector<1x8x18xbf16>
    %177 = vector.shape_cast %176 : vector<1x8x18xbf16> to vector<8x18xbf16>
    %178 = arith.extf %177 : vector<8x18xbf16> to vector<8x18xf32>
    %179 = tpu.concatenate %168, %173, %178 in 0 : vector<8x18xf32>, vector<8x18xf32>, vector<8x18xf32> -> vector<24x18xf32>
    %180 = vector.extract_strided_slice %179 {offsets = [0, 0], sizes = [24, 16], strides = [1, 1]} : vector<24x18xf32> to vector<24x16xf32>
    %181 = vector.extract_strided_slice %179 {offsets = [0, 1], sizes = [24, 16], strides = [1, 1]} : vector<24x18xf32> to vector<24x16xf32>
    %182 = vector.extract_strided_slice %179 {offsets = [0, 2], sizes = [24, 16], strides = [1, 1]} : vector<24x18xf32> to vector<24x16xf32>
    %183 = tpu.concatenate %180, %181, %182 in 0 : vector<24x16xf32>, vector<24x16xf32>, vector<24x16xf32> -> vector<72x16xf32>
    %184 = arith.truncf %183 : vector<72x16xf32> to vector<72x16xbf16>
    %cst_86 = arith.constant dense<0.000000e+00> : vector<8x16xf32>
    %185 = tpu.matmul %3, %184, %cst_86 {dimension_numbers = #tpu.dot_dimension_numbers<[1], [0], [0], [1], [0, 0, 1, 1], [], []>} : vector<8x72xbf16>, vector<72x16xbf16>, vector<8x16xf32> -> vector<8x16xf32>
    %186 = arith.addf %185, %6 : vector<8x16xf32>
    %c0_87 = arith.constant 0 : index
    %187 = arith.index_cast %c6_i32 : i32 to index
    %c0_88 = arith.constant 0 : index
    %c0_89 = arith.constant 0 : index
    %188 = vector.load %arg5[%c0_87, %187, %c0_88, %c0_89] : memref<1x8x8x16xf32, #tpu.memory_space<vmem>>, vector<1x1x8x16xf32>
    %189 = vector.shape_cast %188 : vector<1x1x8x16xf32> to vector<8x16xf32>
    %190 = vector.shape_cast %186 : vector<8x16xf32> to vector<1x1x8x16xf32>
    tpu.vector_store %arg5[%c0_87, %187, %c0_88, %c0_89], %190 {strides = array<i32>} : memref<1x8x8x16xf32, #tpu.memory_space<vmem>>, vector<1x1x8x16xf32>,
    %c7_i32 = arith.constant 7 : i32
    %191 = arith.index_cast %c7_i32 : i32 to index
    %c0_90 = arith.constant 0 : index
    %c0_91 = arith.constant 0 : index
    %192 = vector.load %arg6[%191, %c0_90, %c0_91] : memref<10x8x18xbf16, #tpu.memory_space<vmem>>, vector<1x8x18xbf16>
    %193 = vector.shape_cast %192 : vector<1x8x18xbf16> to vector<8x18xbf16>
    %194 = arith.extf %193 : vector<8x18xbf16> to vector<8x18xf32>
    %c1_i32_92 = arith.constant 1 : i32
    %195 = arith.addi %c7_i32, %c1_i32_92 : i32
    %196 = arith.index_cast %195 : i32 to index
    %c0_93 = arith.constant 0 : index
    %c0_94 = arith.constant 0 : index
    %197 = vector.load %arg6[%196, %c0_93, %c0_94] : memref<10x8x18xbf16, #tpu.memory_space<vmem>>, vector<1x8x18xbf16>
    %198 = vector.shape_cast %197 : vector<1x8x18xbf16> to vector<8x18xbf16>
    %199 = arith.extf %198 : vector<8x18xbf16> to vector<8x18xf32>
    %c2_i32_95 = arith.constant 2 : i32
    %200 = arith.addi %c7_i32, %c2_i32_95 : i32
    %201 = arith.index_cast %200 : i32 to index
    %c0_96 = arith.constant 0 : index
    %c0_97 = arith.constant 0 : index
    %202 = vector.load %arg6[%201, %c0_96, %c0_97] : memref<10x8x18xbf16, #tpu.memory_space<vmem>>, vector<1x8x18xbf16>
    %203 = vector.shape_cast %202 : vector<1x8x18xbf16> to vector<8x18xbf16>
    %204 = arith.extf %203 : vector<8x18xbf16> to vector<8x18xf32>
    %205 = tpu.concatenate %194, %199, %204 in 0 : vector<8x18xf32>, vector<8x18xf32>, vector<8x18xf32> -> vector<24x18xf32>
    %206 = vector.extract_strided_slice %205 {offsets = [0, 0], sizes = [24, 16], strides = [1, 1]} : vector<24x18xf32> to vector<24x16xf32>
    %207 = vector.extract_strided_slice %205 {offsets = [0, 1], sizes = [24, 16], strides = [1, 1]} : vector<24x18xf32> to vector<24x16xf32>
    %208 = vector.extract_strided_slice %205 {offsets = [0, 2], sizes = [24, 16], strides = [1, 1]} : vector<24x18xf32> to vector<24x16xf32>
    %209 = tpu.concatenate %206, %207, %208 in 0 : vector<24x16xf32>, vector<24x16xf32>, vector<24x16xf32> -> vector<72x16xf32>
    %210 = arith.truncf %209 : vector<72x16xf32> to vector<72x16xbf16>
    %cst_98 = arith.constant dense<0.000000e+00> : vector<8x16xf32>
    %211 = tpu.matmul %3, %210, %cst_98 {dimension_numbers = #tpu.dot_dimension_numbers<[1], [0], [0], [1], [0, 0, 1, 1], [], []>} : vector<8x72xbf16>, vector<72x16xbf16>, vector<8x16xf32> -> vector<8x16xf32>
    %212 = arith.addf %211, %6 : vector<8x16xf32>
    %c0_99 = arith.constant 0 : index
    %213 = arith.index_cast %c7_i32 : i32 to index
    %c0_100 = arith.constant 0 : index
    %c0_101 = arith.constant 0 : index
    %214 = vector.load %arg5[%c0_99, %213, %c0_100, %c0_101] : memref<1x8x8x16xf32, #tpu.memory_space<vmem>>, vector<1x1x8x16xf32>
    %215 = vector.shape_cast %214 : vector<1x1x8x16xf32> to vector<8x16xf32>
    %216 = vector.shape_cast %212 : vector<8x16xf32> to vector<1x1x8x16xf32>
    tpu.vector_store %arg5[%c0_99, %213, %c0_100, %c0_101], %216 {strides = array<i32>} : memref<1x8x8x16xf32, #tpu.memory_space<vmem>>, vector<1x1x8x16xf32>,
    %c8_i32_102 = arith.constant 8 : i32
    return
  }
  func.func @transform_1(%arg0: i32, %arg1: i32) -> (i32, i32) {
    %c0_i32 = arith.constant 0 : i32
    %c0_i32_0 = arith.constant 0 : i32
    %c0_i32_1 = arith.constant 0 : i32
    return %c0_i32, %c0_i32_0 : i32, i32
  }
  func.func @transform_2(%arg0: i32, %arg1: i32) -> (i32, i32) {
    %c0_i32 = arith.constant 0 : i32
    %c0_i32_0 = arith.constant 0 : i32
    %c0_i32_1 = arith.constant 0 : i32
    return %c0_i32, %c0_i32_0 : i32, i32
  }
  func.func @transform_3(%arg0: i32, %arg1: i32) -> (i32, i32, i32, i32) {
    %c0_i32 = arith.constant 0 : i32
    %c0_i32_0 = arith.constant 0 : i32
    %c0_i32_1 = arith.constant 0 : i32
    return %arg0, %arg1, %c0_i32, %c0_i32_0 : i32, i32, i32, i32
  }
}

</mosaic_0001>

<bundles_post_ra>
// kernel: tpu_custom_call.1
= control target key start
LH: loop header
LB: loop body
LE: loop exit
PB: predicated region body
PF: predicated region fallthrough
CT: control target
= control target key end

     0   :  { %s1819_s0 = inlined_call_operand.hbm [shape: bf16[2,18,8,18], index: 0, kind: input, shape index: {}]   ;;  %s1820_s1 = inlined_call_operand.vmem [shape: bf16[8,72], index: 1, kind: input, shape index: {}]   ;;  %s1821_s2 = inlined_call_operand.vmem [shape: f32[8,1], index: 2, kind: input, shape index: {}]   ;;  %s1822_s3 = inlined_call_operand.hbm [shape: f32[2,16,8,16], index: 3, kind: output, shape index: {}]  }
   0x1   :  { %1824 = sst [smem:[#allocation12_spill]] %s1820_s1 }
   0x2   :  { %1825 = sst [smem:[#allocation13_spill]] %s1821_s2 }
   0x3   :  { %8 = vsyncpa [#allocation5], 0 }
   0x4   :  { %10 = vsyncpa [#allocation5 + $0x1], 0  ;;  %s1448_s12 = smov 0   ;;  %s1450_s13 = smov 0  }
   0x5   :  { %s1452_s14 = smov 0   ;;  %s1454_s15 = smov 0  }
   0x6   :  { %s1456_s16 = smov 0   ;;  %s1458_s17 = smov 0  }
   0x7   :  { %s1460_s18 = smov 0   ;;  %s1462_s19 = smov 0  }
   0x8 LB: > { %s888_s20 = sadd.s32 4294967295, %s1417_s19   ;;  %s889_s21 = sadd.s32 4294967294, %s1417_s19   ;;  %s1417_s19 = sphi %s1462_s19, %s16_s19   ;;  %s1413_s18 = sphi %s1460_s18, %s1837_s18   ;;  %s1409_s17 = sphi %s1458_s17, %s1836_s17   ;;  %s1405_s16 = sphi %s1456_s16, %s1835_s16   ;;  %s1401_s15 = sphi %s1454_s15, %s1834_s15   ;;  %s1397_s14 = sphi %s1452_s14, %s1833_s14   ;;  %s1393_s13 = sphi %s1450_s13, %s1832_s13   ;;  %s1389_s12 = sphi %s1448_s12, %s1831_s12  }
   0x9   : > { %s25_s22 = sadd.s32 1, %s1409_s17  ;;  %s28_s23 = sadd.s32 1, %s1413_s18 }
   0xa   : > { %p26_p0 = scmp.ge.s32.totalorder %s25_s22, 2  ;;  %p89_p1 = scmp.ne.s32.totalorder %s1397_s14, %s1393_s13 }
   0xb   : > { %p90_p2 = scmp.eq.s32.totalorder %s888_s20, 3  ;;  %p95_p5 = scmp.ne.s32.totalorder %s1393_s13, %s1389_s12 }
   0xc   : > { %s1839_s22 = smov (%p26_p0, %s25_s22), 0  ;;  %s1841_s23 = smov (!%p26_p0, %s28_s23), %s1413_s18 }
   0xd   : > { %s75_s24 = ssub.s32 %s1409_s17, %s1839_s22  ;;  %p1499_p3 = por %p90_p2, %p89_p1 }
   0xe   : > { %p30_p4 = scmp.ge.s32.totalorder %s1841_s23, 2  ;;  %p96_p6 = scmp.eq.s32.totalorder %s889_s21, 3 }
   0xf   : > { %p891_p7 = scmp.ge.s32.totalorder %s1417_s19, 1  ;;  %p120_p9 = scmp.lt.s32.totalorder %s1417_s19, 5 }
  0x10   : > { %s1843_s23 = smov (%p30_p4, %s1841_s23), 0  ;;  %p1508_p8 = por %p96_p6, %p95_p5 }
  0x11   : > { %s74_s27 = ssub.s32 %s1413_s18, %s1843_s23  ;;  %s79_s28 = sadd.s32 1, %s1397_s14 }
  0x12   : > { %s76_s29 = sor.u32 %s75_s24, %s74_s27  ;;  %p121_p10 = pnand %p891_p7, %p120_p9 }
  0x13   : > { %p77_p11 = scmp.eq.s32.totalorder %s76_s29, 0  ;;  %s1828_s2 = sld [smem:[#allocation13_spill]] (!%p121_p10) }
  0x14   : > { %124 = sbr.rel (%p121_p10) target bundleno = 566 (0x236), region = 28  ;;  %s1823_s6 = sand.u32 (!%p121_p10), 1, %s1393_s13  }
  0x15   : > { %s1517_s30 = scalar_select %p77_p11, %s1397_s14, %s79_s28  }
  0x16   : > { %s893_s7 = sshll.u32 (!%p121_p10), %s1401_s15, 3  ;;  %s1829_s1 = sld [smem:[#allocation12_spill]] (!%p121_p10) }
  0x17   : > { %s892_s10 = sshll.u32 (!%p121_p10), %s1823_s6, 6  ;;  %s140_s11 = smul.u32 (!%p121_p10), 18, %s1405_s16 }
  0x18   : > { %s1420_s21 = smov (!%p121_p10), [#allocation2]  }
  0x19   : > { %v156_v0 = vld [vmem:[%s1828_s2] sm:$0xff]  ;;  %v1419_v2 = vmov 0   ;;  %s141_s20 = sadd.s32 %s893_s7, %s140_s11  ;;  %s151_s24 = sshll.u32 %s1420_s21, 4  ;;  %s152_s24 = int_to_ptr.vmem [resolvable:$true] %s151_s24 }
  0x1a   : > { %1164 = vset.pattern.permute.xlu0 %v1419_v2  ;;  %s894_s27 = sshll.u32 %s141_s20, 6 }
  0x1b   : > { %159 = vperm.xlu0 %1164, %v156_v0   ;;  %s143_s4 = scalar_lea.hbm %s1819_s0, %s894_s27 }
  0x1c   : > { %v1527_v1 = vld [vmem:[%s1829_s1] sm:$0xf]  ;;  %s1301_s5 = scalar_lea.hbm %s143_s4, 640  ;;  %s1303_s1 = scalar_lea.hbm %s1819_s0, 2304 }
  0x1d   : > { %p1302_p12 = scmp.ne.s32.totalorder %s143_s4, %s1301_s5  ;;  %p1304_p13 = scmp.lt.s32.totalorder %s143_s4, %s1819_s0 }
  0x1e   : > { %p1305_p0 = scmp.lt.s32.totalorder %s1303_s1, %s1301_s5 }
  0x20   : > { %p1306_p1 = por %p1305_p0, %p1304_p13 }
  0x22   : > { %p1307_p2 = pnand %p1306_p1, %p1302_p12 }
  0x24   : > { %1310 = shalt.err (!%p1307_p2)  }
  0x25   : > { %s1311_s11 = scalar_lea.vmem %s152_s24, 640  ;;  %p1316_p5 = scmp.lt.s32.totalorder %s152_s24, %s152_s24 }
  0x26   : > { %p1312_p4 = scmp.ne.s32.totalorder %s152_s24, %s1311_s11  ;;  %p1317_p6 = scmp.lt.s32.totalorder %s1311_s11, %s1311_s11 }
  0x28   : > { %p1318_p7 = por %p1317_p6, %p1316_p5 }
  0x2a   : > { %p1319_p9 = pnand %p1318_p7, %p1312_p4 }
  0x2c   : > { %1322 = shalt.err (!%p1319_p9)  }
  0x2d   : > { %154 = dma.hbm_to_vmem [thread:$0]  %s143_s4, 640, %s152_s24, [#allocation3] }
  0x2e   : > { %s1545_s20 = scalar_lea.vmem [#allocation4], %s892_s10 }
  0x96   : > { %v1543_v3 = vpop.permute.xlu0 %159 }
  0x97   : > { %1381 = dma.done.wait [#allocation3], 640 }
  0x98   : > { %1382 = vsyncadd [#allocation3], 4294966656  ;;  %v1421_v4 = vmov 0.0   ;;  %v173_v5 = vld [vmem:[#allocation2 + $0x8] sm:$0xff]   ;;  %v1551_v7 = vld [vmem:[#allocation2] sm:$0xff]   ;;  %s1422_s1 = smov 126  }
  0x99   : > { %973 = vmatprep.subr.bf16.mxu0 %v1421_v4  ;;  %987 = vmatprep.subr.bf16.mxu1 %v1421_v4  ;;  %v1549_v6 = vld [vmem:[#allocation2 + $0x4] sm:$0xff]   ;;  %v1553_v8 = vunpack.c.l.bf16 %v173_v5  ;;  %v1555_v9 = vunpack.c.h.bf16 %v173_v5  ;;  %v168_v12 = vunpack.c.l.bf16 %v1551_v7  ;;  %v171_v13 = vunpack.c.h.bf16 %v1551_v7  ;;  %v334_v18 = vld [vmem:[#allocation2 + $0x10] sm:$0xff]   ;;  %s1423_s2 = smov 127   ;;  %v490_v33 = vld [vmem:[#allocation2 + $0x18] sm:$0xff]   ;;  %s920_s6 = sshll.u32 %s1405_s16, 4 }
  0x9a   : > { %v252_v10 = vunpack.c.l.bf16 %v1549_v6  ;;  %v254_v11 = vunpack.c.h.bf16 %v1549_v6  ;;  %v1566_v19 = vld [vmem:[#allocation2 + $0x8] sm:$0xff]   ;;  %v1568_v20 = vunpack.c.l.bf16 %v334_v18  ;;  %v1570_v21 = vunpack.c.h.bf16 %v334_v18  ;;  %v1592_v34 = vld [vmem:[#allocation2 + $0x10] sm:$0xff]   ;;  %v646_v48 = vld [vmem:[#allocation2 + $0x20] sm:$0xff]   ;;  %s810_s10 = sadd.s32 %s920_s6, %s893_s7  ;;  %s813_s24 = sshll.u32 %s1545_s20, 4  ;;  %s1758_s24 = int_to_ptr.vmem [resolvable:$true] %s813_s24 }
  0x9b   : > { %v1165_v14 = vpack.i.bf16 %v1555_v9, %v1553_v8  ;;  %v1170_v16 = vpack.i.bf16 %v171_v13, %v168_v12  ;;  %v1180_v17 = vpack.i.bf16 %v1553_v8, %v171_v13  ;;  %v330_v24 = vunpack.c.l.bf16 %v1566_v19  ;;  %v1577_v26 = vld [vmem:[#allocation2 + $0xc] sm:$0xff]   ;;  %v1603_v41 = vld [vmem:[#allocation2 + $0x14] sm:$0xff]   ;;  %v1625_v56 = vld [vmem:[#allocation2 + $0x1c] sm:$0xff]   ;;  %s921_s21 = sshll.u32 %s810_s10, 7  ;;  %s1830_s15 = sand.u32 1, %s1393_s13  }
  0x9c   : > { %v1175_v15 = vpack.i.bf16 %v254_v11, %v252_v10  ;;  %v1185_v22 = vpack.i.bf16 %v1555_v9, %v254_v11  ;;  %v1190_v23 = vpack.i.bf16 %v252_v10, %v168_v12  ;;  %v332_v25 = vunpack.c.h.bf16 %v1566_v19  ;;  %v1614_v49 = vld [vmem:[#allocation2 + $0x18] sm:$0xff]   ;;  %s1756_s29 = scalar_lea.hbm %s1822_s3, %s921_s21  ;;  %s1768_s16 = scalar_lea.sflag [#allocation5], %s1830_s15 }
  0x9d   : > { %1166 = vrot.lane.b32.xlu0 %v1165_v14, %s1422_s1  ;;  %v1195_v27 = vpack.i.bf16 %v1570_v21, %v1568_v20  ;;  %v408_v29 = vunpack.c.l.bf16 %v1577_v26  ;;  %v410_v30 = vunpack.c.h.bf16 %v1577_v26  ;;  %vm1424_vm0 = vmmov 0   ;;  %s1323_s7 = scalar_lea.vmem %s1758_s24, 1024  ;;  %s1425_s4 = smov [#allocation4]  }
  0x9e   : > { %1176 = vrot.lane.b32.xlu1 %v1175_v15, %s1422_s1  ;;  %v1200_v28 = vpack.i.bf16 %v332_v25, %v330_v24  ;;  %983 = vmatprep.mubr.msk.bf16.mxu0 %vm1424_vm0, %v1421_v4  ;;  %v1210_v32 = vpack.i.bf16 %v1568_v20, %v332_v25  ;;  %v1594_v35 = vunpack.c.l.bf16 %v490_v33  ;;  %v1596_v36 = vunpack.c.h.bf16 %v490_v33  ;;  %p1324_p10 = scmp.ne.s32.totalorder %s1758_s24, %s1323_s7  ;;  %s1327_s5 = sshll.u32 %s1425_s4, 4  ;;  %s1328_s5 = int_to_ptr.vmem [resolvable:$false] %s1327_s5 }
  0x9f   : > { %997 = vmatprep.mubr.msk.bf16.mxu1 %vm1424_vm0, %v1421_v4  ;;  %v1205_v31 = vpack.i.bf16 %v410_v30, %v408_v29  ;;  %v1215_v37 = vpack.i.bf16 %v1570_v21, %v410_v30  ;;  %v1220_v38 = vpack.i.bf16 %v408_v29, %v330_v24  ;;  %v486_v39 = vunpack.c.l.bf16 %v1592_v34  ;;  %s1329_s8 = scalar_lea.vmem %s1328_s5, 2048  ;;  %p1330_p13 = scmp.lt.s32.totalorder %s1758_s24, %s1328_s5 }
  0xa0   : > { %v488_v40 = vunpack.c.h.bf16 %v1592_v34  ;;  %v1225_v42 = vpack.i.bf16 %v1596_v36, %v1594_v35  ;;  %v564_v44 = vunpack.c.l.bf16 %v1603_v41  ;;  %v566_v45 = vunpack.c.h.bf16 %v1603_v41  ;;  %p1325_p11 = pnand %p1324_p10, %p1499_p3  ;;  %p1331_p0 = scmp.lt.s32.totalorder %s1329_s8, %s1323_s7 }
  0xa1   : > { %1171 = vrot.lane.b32.xlu0 %v1170_v16, %s1422_s1  ;;  %v1616_v51 = vunpack.c.l.bf16 %v646_v48  ;;  %v1621_v53 = vunpack.c.h.bf16 %v646_v48  ;;  %v642_v54 = vunpack.c.l.bf16 %v1614_v49  ;;  %v644_v55 = vunpack.c.h.bf16 %v1614_v49 }
  0xa2   : > { %1181 = vrot.lane.b32.xlu1 %v1180_v17, %s1423_s2  ;;  %v1230_v43 = vpack.i.bf16 %v488_v40, %v486_v39  ;;  %v1235_v46 = vpack.i.bf16 %v566_v45, %v564_v44  ;;  %v1240_v47 = vpack.i.bf16 %v1594_v35, %v488_v40  ;;  %v1250_v50 = vpack.i.bf16 %v564_v44, %v486_v39  ;;  %p1326_p12 = pneg %p1325_p11  ;;  %p1332_p1 = por %p1331_p0, %p1330_p13 }
  0xa3   : > { %v1245_v52 = vpack.i.bf16 %v1596_v36, %v566_v45  ;;  %v1255_v57 = vpack.i.bf16 %v1621_v53, %v1616_v51  ;;  %v1260_v58 = vpack.i.bf16 %v644_v55, %v642_v54  ;;  %v720_v59 = vunpack.c.l.bf16 %v1625_v56 }
  0xa4   : > { %v722_v60 = vunpack.c.h.bf16 %v1625_v56  ;;  %v1270_v62 = vpack.i.bf16 %v1616_v51, %v644_v55  ;;  %vm205_vm1 = vcmask 1043456   ;;  %vm201_vm2 = vcmask 588800   ;;  %p1333_p2 = pnand %p1332_p1, %p1326_p12 }
  0xa5   : > { %1186 = vrot.lane.b32.xlu0 %v1185_v22, %s1423_s2  ;;  %v1280_v0 = vpack.i.bf16 %v720_v59, %v642_v54  ;;  %vm249_vm3 = vcmask 130048  }
  0xa6   : > { %1191 = vrot.lane.b32.xlu1 %v1190_v23, %s1423_s2  ;;  %v1265_v61 = vpack.i.bf16 %v722_v60, %v720_v59  ;;  %v1275_v63 = vpack.i.bf16 %v1621_v53, %v722_v60 }
  0xa9   : > { %1196 = vrot.lane.b32.xlu0 %v1195_v27, %s1422_s1 }
  0xaa   : > { %1201 = vrot.lane.b32.xlu1 %v1200_v28, %s1422_s1 }
  0xad   : > { %1206 = vrot.lane.b32.xlu0 %v1205_v31, %s1422_s1 }
  0xae   : > { %1211 = vrot.lane.b32.xlu1 %v1210_v32, %s1423_s2 }
  0xb1   : > { %1216 = vrot.lane.b32.xlu0 %v1215_v37, %s1423_s2 }
  0xb2   : > { %1221 = vrot.lane.b32.xlu1 %v1220_v38, %s1423_s2 }
  0xb5   : > { %1226 = vrot.lane.b32.xlu0 %v1225_v42, %s1422_s1 }
  0xb6   : > { %1231 = vrot.lane.b32.xlu1 %v1230_v43, %s1422_s1 }
  0xb9   : > { %1236 = vrot.lane.b32.xlu0 %v1235_v46, %s1422_s1 }
  0xba   : > { %1241 = vrot.lane.b32.xlu1 %v1240_v47, %s1423_s2 }
  0xbd   : > { %1246 = vrot.lane.b32.xlu0 %v1245_v52, %s1423_s2 }
  0xbe   : > { %1251 = vrot.lane.b32.xlu1 %v1250_v50, %s1423_s2 }
  0xc1   : > { %1256 = vrot.lane.b32.xlu0 %v1255_v57, %s1422_s1 }
  0xc2   : > { %1261 = vrot.lane.b32.xlu1 %v1260_v58, %s1422_s1 }
  0xc5   : > { %1266 = vrot.lane.b32.xlu0 %v1265_v61, %s1422_s1 }
  0xc6   : > { %1271 = vrot.lane.b32.xlu1 %v1270_v62, %s1423_s2 }
  0xc9   : > { %1276 = vrot.lane.b32.xlu0 %v1275_v63, %s1423_s2 }
  0xca   : > { %1281 = vrot.lane.b32.xlu1 %v1280_v0, %s1423_s2 }
 0x10f   : > { %v1167_v2 = vpop.permute.xlu0 %1166 }
 0x110   : > { %v1177_v5 = vpop.permute.xlu1 %1176  ;;  %v1169_v10 = vunpack.i.h.bf16 %v1167_v2  ;;  %v1168_v11 = vunpack.i.l.bf16 %v1167_v2 }
 0x111   : > { %v1179_v12 = vunpack.i.h.bf16 %v1177_v5  ;;  %v1178_v13 = vunpack.i.l.bf16 %v1177_v5 }
 0x112   : > { %v283_v14 = vpack.c.bf16 %v1169_v10, %v1169_v10  ;;  %v200_v15 = vpack.c.bf16 %v1168_v11, %v1168_v11 }
 0x113   : > { %v1172_v16 = vpop.permute.xlu0 %1171  ;;  %v282_v25 = vpack.c.bf16 %v1179_v12, %v1178_v13 }
 0x114   : > { %v1182_v17 = vpop.permute.xlu1 %1181  ;;  %v1174_v18 = vunpack.i.h.bf16 %v1172_v16  ;;  %v1173_v22 = vunpack.i.l.bf16 %v1172_v16  ;;  %v207_v23 = vsel %vm205_vm1, %v200_v15, 0  ;;  %v285_v24 = vsel %vm205_vm1, %v283_v14, 0 }
 0x115   : > { %974 = vmatpush3.bf16.msra.mxu0 %v207_v23  ;;  %988 = vmatpush3.bf16.msra.mxu1 %v285_v24  ;;  %v1184_v27 = vunpack.i.h.bf16 %v1182_v17  ;;  %v1183_v28 = vunpack.i.l.bf16 %v1182_v17 }
 0x116   : > { %v199_v29 = vpack.c.bf16 %v1174_v18, %v1173_v22  ;;  %975 = vmatprep.subr.bf16.mxu0 %v1421_v4  ;;  %989 = vmatprep.subr.bf16.mxu1 %v1421_v4 }
 0x117   : > { %v1187_v30 = vpop.permute.xlu0 %1186  ;;  %v198_v37 = vpack.c.bf16 %v1184_v27, %v1183_v28 }
 0x118   : > { %v1192_v31 = vpop.permute.xlu1 %1191  ;;  %v1189_v32 = vunpack.i.h.bf16 %v1187_v30  ;;  %v1188_v33 = vunpack.i.l.bf16 %v1187_v30 }
 0x119   : > { %976 = vmatpush3.bf16.msra.mxu0 %v199_v29  ;;  %990 = vmatpush3.bf16.msra.mxu1 %v282_v25  ;;  %v1194_v38 = vunpack.i.h.bf16 %v1192_v31  ;;  %v1193_v39 = vunpack.i.l.bf16 %v1192_v31 }
 0x11a   : > { %v281_v40 = vpack.c.bf16 %v1189_v32, %v1188_v33  ;;  %991 = vmatprep.subr.bf16.mxu1 %v1421_v4  ;;  %977 = vmatprep.subr.bf16.mxu0 %v1421_v4 }
 0x11b   : > { %v1197_v42 = vpop.permute.xlu0 %1196  ;;  %v280_v43 = vpack.c.bf16 %v1194_v38, %v1555_v9  ;;  %v197_v44 = vpack.c.bf16 %v1193_v39, %v1553_v8 }
 0x11c   : > { %v1199_v45 = vunpack.i.h.bf16 %v1197_v42  ;;  %v1198_v46 = vunpack.i.l.bf16 %v1197_v42  ;;  %v1202_v47 = vpop.permute.xlu1 %1201 }
 0x11d   : > { %978 = vmatpush3.bf16.msra.mxu0 %v198_v37  ;;  %992 = vmatpush3.bf16.msra.mxu1 %v281_v40  ;;  %v1204_v9 = vunpack.i.h.bf16 %v1202_v47  ;;  %v1203_v8 = vunpack.i.l.bf16 %v1202_v47 }
 0x11e   : > { %979 = vmatprep.subr.bf16.mxu0 %v1421_v4  ;;  %993 = vmatprep.subr.bf16.mxu1 %v1421_v4  ;;  %v439_v50 = vpack.c.bf16 %v1199_v45, %v1199_v45  ;;  %v361_v52 = vpack.c.bf16 %v1198_v46, %v1198_v46 }
 0x11f   : > { %v1207_v48 = vpop.permute.xlu0 %1206  ;;  %v360_v61 = vpack.c.bf16 %v1204_v9, %v1203_v8 }
 0x120   : > { %v1212_v54 = vpop.permute.xlu1 %1211  ;;  %v1209_v55 = vunpack.i.h.bf16 %v1207_v48  ;;  %v1208_v57 = vunpack.i.l.bf16 %v1207_v48  ;;  %v363_v58 = vsel %vm205_vm1, %v361_v52, 0  ;;  %v441_v59 = vsel %vm205_vm1, %v439_v50, 0 }
 0x121   : > { %980 = vmatpush3.bf16.msra.mxu0 %v197_v44  ;;  %994 = vmatpush3.bf16.msra.mxu1 %v280_v43  ;;  %v1213_v62 = vunpack.i.l.bf16 %v1212_v54 }
 0x122   : > { %981 = vmatprep.subr.bf16.mxu0 %v1421_v4  ;;  %995 = vmatprep.subr.bf16.mxu1 %v1421_v4 }
 0x123   : > { %v1217_v60 = vpop.permute.xlu0 %1216 }
 0x124   : > { %v1219_v63 = vunpack.i.h.bf16 %v1217_v60  ;;  %v1218_v0 = vunpack.i.l.bf16 %v1217_v60  ;;  %v1222_v2 = vpop.permute.xlu1 %1221 }
 0x125   : > { %982 = vmatpush3.bf16.msra.mxu0 %v1551_v7  ;;  %996 = vmatpush3.bf16.msra.mxu1 %v1549_v6  ;;  %v1214_v6 = vunpack.i.h.bf16 %v1212_v54  ;;  %v438_v7 = vpack.c.bf16 %v1209_v55, %v1208_v57  ;;  %v1224_v11 = vunpack.i.h.bf16 %v1222_v2  ;;  %v1223_v12 = vunpack.i.l.bf16 %v1222_v2 }
 0x126   : > { %1001 = vmatprep.subr.bf16.mxu0 %v1421_v4  ;;  %1015 = vmatprep.subr.bf16.mxu1 %v1421_v4  ;;  %v437_v10 = vpack.c.bf16 %v1219_v63, %v1218_v0 }
 0x127   : > { %v359_v5 = vpack.c.bf16 %v1214_v6, %v1213_v62  ;;  %v1227_v13 = vpop.permute.xlu0 %1226  ;;  %v436_v14 = vpack.c.bf16 %v1224_v11, %v1570_v21  ;;  %v358_v15 = vpack.c.bf16 %v1223_v12, %v1568_v20 }
 0x128   : > { %984 = vmatmul.mubr.msk.bf16.vlgmr.msra.gmra.mxu0 %vm201_vm2, %v1527_v1  ;;  %998 = vmatmul.mubr.msk.bf16.vlgmr.msra.gmra.mxu1 %vm201_vm2, %v1527_v1  ;;  %v1229_v16 = vunpack.i.h.bf16 %v1227_v13  ;;  %v1228_v17 = vunpack.i.l.bf16 %v1227_v13  ;;  %v1232_v18 = vpop.permute.xlu1 %1231 }
 0x129   : > { %1002 = vmatpush3.bf16.msra.mxu0 %v363_v58  ;;  %1016 = vmatpush3.bf16.msra.mxu1 %v441_v59  ;;  %v1234_v21 = vunpack.i.h.bf16 %v1232_v18  ;;  %v1233_v20 = vunpack.i.l.bf16 %v1232_v18 }
 0x12a   : > { %1003 = vmatprep.subr.bf16.mxu0 %v1421_v4  ;;  %1017 = vmatprep.subr.bf16.mxu1 %v1421_v4  ;;  %v595_v23 = vpack.c.bf16 %v1229_v16, %v1229_v16  ;;  %v517_v24 = vpack.c.bf16 %v1228_v17, %v1228_v17 }
 0x12b   : > { %1011 = vmatprep.mubr.msk.bf16.mxu0 %vm1424_vm0, %v1421_v4  ;;  %1025 = vmatprep.mubr.msk.bf16.mxu1 %vm1424_vm0, %v1421_v4  ;;  %v1237_v22 = vpop.permute.xlu0 %1236  ;;  %v516_v32 = vpack.c.bf16 %v1234_v21, %v1233_v20 }
 0x12c   : > { %v1242_v25 = vpop.permute.xlu1 %1241  ;;  %v1239_v27 = vunpack.i.h.bf16 %v1237_v22  ;;  %v1238_v28 = vunpack.i.l.bf16 %v1237_v22  ;;  %v519_v29 = vsel %vm205_vm1, %v517_v24, 0  ;;  %v597_v30 = vsel %vm205_vm1, %v595_v23, 0 }
 0x12d   : > { %1004 = vmatpush3.bf16.msra.mxu0 %v360_v61  ;;  %1018 = vmatpush3.bf16.msra.mxu1 %v438_v7  ;;  %v1243_v33 = vunpack.i.l.bf16 %v1242_v25 }
 0x12e   : > { %1005 = vmatprep.subr.bf16.mxu0 %v1421_v4  ;;  %1019 = vmatprep.subr.bf16.mxu1 %v1421_v4 }
 0x12f   : > { %v1247_v31 = vpop.permute.xlu0 %1246 }
 0x130   : > { %v1249_v37 = vunpack.i.h.bf16 %v1247_v31  ;;  %v1248_v38 = vunpack.i.l.bf16 %v1247_v31  ;;  %v1252_v39 = vpop.permute.xlu1 %1251 }
 0x131   : > { %1006 = vmatpush3.bf16.msra.mxu0 %v359_v5  ;;  %1020 = vmatpush3.bf16.msra.mxu1 %v437_v10  ;;  %v1254_v43 = vunpack.i.h.bf16 %v1252_v39  ;;  %v1253_v44 = vunpack.i.l.bf16 %v1252_v39 }
 0x132   : > { %1007 = vmatprep.subr.bf16.mxu0 %v1421_v4  ;;  %1021 = vmatprep.subr.bf16.mxu1 %v1421_v4  ;;  %v593_v42 = vpack.c.bf16 %v1249_v37, %v1248_v38 }
 0x133   : > { %v1257_v45 = vpop.permute.xlu0 %1256  ;;  %v592_v46 = vpack.c.bf16 %v1254_v43, %v1596_v36  ;;  %v514_v47 = vpack.c.bf16 %v1253_v44, %v1594_v35 }
 0x134   : > { %v1259_v48 = vunpack.i.h.bf16 %v1257_v45  ;;  %v1258_v50 = vunpack.i.l.bf16 %v1257_v45  ;;  %v1262_v52 = vpop.permute.xlu1 %1261 }
 0x135   : > { %1008 = vmatpush3.bf16.msra.mxu0 %v358_v15  ;;  %1022 = vmatpush3.bf16.msra.mxu1 %v436_v14  ;;  %v1264_v36 = vunpack.i.h.bf16 %v1262_v52  ;;  %v1263_v35 = vunpack.i.l.bf16 %v1262_v52 }
 0x136   : > { %1009 = vmatprep.subr.bf16.mxu0 %v1421_v4  ;;  %1023 = vmatprep.subr.bf16.mxu1 %v1421_v4  ;;  %v751_v8 = vpack.c.bf16 %v1259_v48, %v1259_v48  ;;  %v673_v54 = vpack.c.bf16 %v1258_v50, %v1258_v50 }
 0x137   : > { %v1267_v9 = vpop.permute.xlu0 %1266  ;;  %v672_v6 = vpack.c.bf16 %v1264_v36, %v1263_v35 }
 0x138   : > { %v1272_v55 = vpop.permute.xlu1 %1271  ;;  %v1269_v57 = vunpack.i.h.bf16 %v1267_v9  ;;  %v1268_v58 = vunpack.i.l.bf16 %v1267_v9  ;;  %v675_v59 = vsel %vm205_vm1, %v673_v54, 0  ;;  %v753_v60 = vsel %vm205_vm1, %v751_v8, 0 }
 0x139   : > { %1010 = vmatpush3.bf16.msra.mxu0 %v1566_v19  ;;  %1024 = vmatpush3.bf16.msra.mxu1 %v1577_v26  ;;  %v1244_v19 = vunpack.i.h.bf16 %v1242_v25  ;;  %v594_v26 = vpack.c.bf16 %v1239_v27, %v1238_v28  ;;  %v1273_v7 = vunpack.i.l.bf16 %v1272_v55 }
 0x13a   : > { %1029 = vmatprep.subr.bf16.mxu0 %v1421_v4  ;;  %1043 = vmatprep.subr.bf16.mxu1 %v1421_v4 }
 0x13b   : > { %v515_v40 = vpack.c.bf16 %v1244_v19, %v1243_v33  ;;  %v1277_v61 = vpop.permute.xlu0 %1276 }
 0x13c   : > { %1012 = vmatmul.mubr.msk.bf16.vlgmr.msra.gmra.mxu0 %vm201_vm2, %v1527_v1  ;;  %1026 = vmatmul.mubr.msk.bf16.vlgmr.msra.gmra.mxu1 %vm201_vm2, %v1527_v1  ;;  %v1279_v62 = vunpack.i.h.bf16 %v1277_v61  ;;  %v1278_v63 = vunpack.i.l.bf16 %v1277_v61  ;;  %v1282_v0 = vpop.permute.xlu1 %1281 }
 0x13d   : > { %1030 = vmatpush3.bf16.msra.mxu0 %v519_v29  ;;  %1044 = vmatpush3.bf16.msra.mxu1 %v597_v30  ;;  %v1284_v10 = vunpack.i.h.bf16 %v1282_v0  ;;  %v1283_v11 = vunpack.i.l.bf16 %v1282_v0 }
 0x13e   : > { %1031 = vmatprep.subr.bf16.mxu0 %v1421_v4  ;;  %1045 = vmatprep.subr.bf16.mxu1 %v1421_v4  ;;  %v749_v5 = vpack.c.bf16 %v1279_v62, %v1278_v63 }
 0x13f   : > { %1039 = vmatprep.mubr.msk.bf16.mxu0 %vm1424_vm0, %v1421_v4  ;;  %1053 = vmatprep.mubr.msk.bf16.mxu1 %vm1424_vm0, %v1421_v4  ;;  %v748_v12 = vpack.c.bf16 %v1284_v10, %v1621_v53  ;;  %v670_v13 = vpack.c.bf16 %v1283_v11, %v1616_v51 }
 0x141   : > { %1032 = vmatpush3.bf16.msra.mxu0 %v516_v32  ;;  %1046 = vmatpush3.bf16.msra.mxu1 %v594_v26 }
 0x142   : > { %1033 = vmatprep.subr.bf16.mxu0 %v1421_v4  ;;  %1047 = vmatprep.subr.bf16.mxu1 %v1421_v4 }
 0x145   : > { %1034 = vmatpush3.bf16.msra.mxu0 %v515_v40  ;;  %1048 = vmatpush3.bf16.msra.mxu1 %v593_v42 }
 0x146   : > { %1035 = vmatprep.subr.bf16.mxu0 %v1421_v4  ;;  %1049 = vmatprep.subr.bf16.mxu1 %v1421_v4 }
 0x149   : > { %1036 = vmatpush3.bf16.msra.mxu0 %v514_v47  ;;  %1050 = vmatpush3.bf16.msra.mxu1 %v592_v46 }
 0x14a   : > { %1037 = vmatprep.subr.bf16.mxu0 %v1421_v4  ;;  %1051 = vmatprep.subr.bf16.mxu1 %v1421_v4 }
 0x14d   : > { %1038 = vmatpush3.bf16.msra.mxu0 %v1592_v34  ;;  %1052 = vmatpush3.bf16.msra.mxu1 %v1603_v41  ;;  %v1274_v34 = vunpack.i.h.bf16 %v1272_v55  ;;  %v750_v41 = vpack.c.bf16 %v1269_v57, %v1268_v58 }
 0x14e   : > { %1057 = vmatprep.subr.bf16.mxu0 %v1421_v4  ;;  %1071 = vmatprep.subr.bf16.mxu1 %v1421_v4 }
 0x14f   : > { %v671_v2 = vpack.c.bf16 %v1274_v34, %v1273_v7 }
 0x150   : > { %1040 = vmatmul.mubr.msk.bf16.vlgmr.msra.gmra.mxu0 %vm201_vm2, %v1527_v1  ;;  %1054 = vmatmul.mubr.msk.bf16.vlgmr.msra.gmra.mxu1 %vm201_vm2, %v1527_v1 }
 0x151   : > { %1058 = vmatpush3.bf16.msra.mxu0 %v675_v59  ;;  %1072 = vmatpush3.bf16.msra.mxu1 %v753_v60 }
 0x152   : > { %1059 = vmatprep.subr.bf16.mxu0 %v1421_v4  ;;  %1073 = vmatprep.subr.bf16.mxu1 %v1421_v4 }
 0x153   : > { %1067 = vmatprep.mubr.msk.bf16.mxu0 %vm1424_vm0, %v1421_v4  ;;  %1081 = vmatprep.mubr.msk.bf16.mxu1 %vm1424_vm0, %v1421_v4 }
 0x155   : > { %1060 = vmatpush3.bf16.msra.mxu0 %v672_v6  ;;  %1074 = vmatpush3.bf16.msra.mxu1 %v750_v41 }
 0x156   : > { %1061 = vmatprep.subr.bf16.mxu0 %v1421_v4  ;;  %1075 = vmatprep.subr.bf16.mxu1 %v1421_v4 }
 0x159   : > { %1062 = vmatpush3.bf16.msra.mxu0 %v671_v2  ;;  %1076 = vmatpush3.bf16.msra.mxu1 %v749_v5 }
 0x15a   : > { %1063 = vmatprep.subr.bf16.mxu0 %v1421_v4  ;;  %1077 = vmatprep.subr.bf16.mxu1 %v1421_v4 }
 0x15d   : > { %1064 = vmatpush3.bf16.msra.mxu0 %v670_v13  ;;  %1078 = vmatpush3.bf16.msra.mxu1 %v748_v12 }
 0x15e   : > { %1065 = vmatprep.subr.bf16.mxu0 %v1421_v4  ;;  %1079 = vmatprep.subr.bf16.mxu1 %v1421_v4 }
 0x161   : > { %1066 = vmatpush3.bf16.msra.mxu0 %v1614_v49  ;;  %1080 = vmatpush3.bf16.msra.mxu1 %v1625_v56 }
 0x164   : > { %1068 = vmatmul.mubr.msk.bf16.vlgmr.msra.gmra.mxu0 %vm201_vm2, %v1527_v1  ;;  %1082 = vmatmul.mubr.msk.bf16.vlgmr.msra.gmra.mxu1 %vm201_vm2, %v1527_v1 }
 0x1e8   : > { %v243_v51 = vpop.f32.mrf.mxu0  ;;  %v321_v53 = vpop.f32.mrf.mxu1 }
 0x1e9   : > { %v244_v14 = vadd.f32 %v243_v51, %v1543_v3  ;;  %v322_v15 = vadd.f32 %v321_v53, %v1543_v3 }
 0x1ea   : > { %v985_v4 = vpop.f32.mrf.mxu0  ;;  %v999_v16 = vpop.f32.mrf.mxu1 }
 0x1eb   : > { %250 = vst.msk [vmem:[%s1545_s20] sm:$0xff] %vm249_vm3, %v244_v14  ;;  %899 = vst.msk [vmem:[%s1545_s20 + $0x8] sm:$0xff] %vm249_vm3, %v322_v15 }
 0x1ec   : > { %v246_v49 = vpop.f32.mrf.mxu0  ;;  %v324_v56 = vpop.f32.mrf.mxu1 }
 0x1ee   : > { %v986_v17 = vpop.f32.mrf.mxu0  ;;  %v1000_v18 = vpop.f32.mrf.mxu1 }
 0x1fc   : > { %v399_v1 = vpop.f32.mrf.mxu0  ;;  %v477_v22 = vpop.f32.mrf.mxu1 }
 0x1fd   : > { %v400_v23 = vadd.f32 %v399_v1, %v1543_v3  ;;  %v478_v24 = vadd.f32 %v477_v22, %v1543_v3 }
 0x1fe   : > { %v1013_v21 = vpop.f32.mrf.mxu0  ;;  %v1027_v20 = vpop.f32.mrf.mxu1 }
 0x1ff   : > { %902 = vst.msk [vmem:[%s1545_s20 + $0x10] sm:$0xff] %vm249_vm3, %v400_v23  ;;  %905 = vst.msk [vmem:[%s1545_s20 + $0x18] sm:$0xff] %vm249_vm3, %v478_v24 }
 0x200   : > { %v402_v25 = vpop.f32.mrf.mxu0  ;;  %v480_v27 = vpop.f32.mrf.mxu1 }
 0x202   : > { %v1014_v28 = vpop.f32.mrf.mxu0  ;;  %v1028_v29 = vpop.f32.mrf.mxu1 }
 0x210   : > { %v555_v30 = vpop.f32.mrf.mxu0  ;;  %v633_v31 = vpop.f32.mrf.mxu1 }
 0x211   : > { %v556_v32 = vadd.f32 %v555_v30, %v1543_v3  ;;  %v634_v19 = vadd.f32 %v633_v31, %v1543_v3 }
 0x212   : > { %v1041_v26 = vpop.f32.mrf.mxu0  ;;  %v1055_v33 = vpop.f32.mrf.mxu1 }
 0x213   : > { %908 = vst.msk [vmem:[%s1545_s20 + $0x20] sm:$0xff] %vm249_vm3, %v556_v32  ;;  %911 = vst.msk [vmem:[%s1545_s20 + $0x28] sm:$0xff] %vm249_vm3, %v634_v19 }
 0x214   : > { %v558_v37 = vpop.f32.mrf.mxu0  ;;  %v636_v38 = vpop.f32.mrf.mxu1 }
 0x216   : > { %v1042_v39 = vpop.f32.mrf.mxu0  ;;  %v1056_v40 = vpop.f32.mrf.mxu1 }
 0x224   : > { %v711_v42 = vpop.f32.mrf.mxu0  ;;  %v789_v43 = vpop.f32.mrf.mxu1 }
 0x225   : > { %v712_v44 = vadd.f32 %v711_v42, %v1543_v3  ;;  %v790_v45 = vadd.f32 %v789_v43, %v1543_v3 }
 0x226   : > { %v1069_v46 = vpop.f32.mrf.mxu0  ;;  %v1083_v47 = vpop.f32.mrf.mxu1 }
 0x227   : > { %914 = vst.msk [vmem:[%s1545_s20 + $0x30] sm:$0xff] %vm249_vm3, %v712_v44  ;;  %917 = vst.msk [vmem:[%s1545_s20 + $0x38] sm:$0xff] %vm249_vm3, %v790_v45 }
 0x228   : > { %v714_v48 = vpop.f32.mrf.mxu0  ;;  %v792_v50 = vpop.f32.mrf.mxu1 }
 0x229   : > { %1336 = shalt.err (!%p1333_p2)
}
 0x22a   : > { %s1337_s9 = scalar_lea.hbm %s1756_s29, 1024  ;;  %s1341_s1 = scalar_lea.hbm %s1822_s3, 4096 }
 0x22b   : > { %p1338_p4 = scmp.ne.s32.totalorder %s1756_s29, %s1337_s9  ;;  %p1342_p7 = scmp.lt.s32.totalorder %s1756_s29, %s1822_s3 }
 0x22c   : > { %p1343_p9 = scmp.lt.s32.totalorder %s1341_s1, %s1337_s9 }
 0x22d   : > { %p1339_p5 = pnand %p1338_p4, %p1499_p3 }
 0x22e   : > { %p1344_p10 = por %p1343_p9, %p1342_p7 }
 0x22f   : > { %p1340_p6 = pneg %p1339_p5 }
 0x231   : > { %p1345_p11 = pnand %p1344_p10, %p1340_p6 }
 0x233   : > { %1348 = shalt.err (!%p1345_p11)
}
 0x234   : > { %s1426_s10 = smov 128   ;;  %s1427_s21 = smov 8   ;;  %v1070_v3 = vpop.f32.mrf.mxu0  ;;  %v1084_v52 = vpop.f32.mrf.mxu1 }
 0x235   : > { %1085 = dma.vmem_to_hbm [thread:$0]  (%p1499_p3), %s1758_s24, 1024, %s1756_s29, %s1768_s16, %s1426_s10, %s1426_s10, %s1427_s21  }
 0x236 PF: > { %p1091_p12 = scmp.ge.s32.totalorder %s1417_s19, 2  ;;  %s828_s27 = sand.u32 1, %s1389_s12  }
 0x237   : > { %s829_s28 = scalar_lea.sflag [#allocation5], %s828_s27 }
 0x238   : > { %p1088_p13 = pnand %p1091_p12, %p1508_p8 }
 0x23a   : > { %p1089_p0 = pneg %p1088_p13 }
 0x23c   : > { %1384 = dma.done.wait (%p1089_p0), %s829_s28, 1024  }
 0x23d   : > { %1386 = vsyncadd (%p1089_p0), %s829_s28, 4294966272  ;;  %s16_s19 = sadd.s32 1, %s1417_s19   ;;  %s1831_s12 = smov %s1393_s13 }
 0x23e   : > { %p13_p1 = scmp.ge.s32.totalorder %s16_s19, 6   ;;  %s1832_s13 = smov %s1397_s14 }
 0x23f   : > { %s1833_s14 = smov %s1517_s30  ;;  %s1834_s15 = smov %s1409_s17 }
 0x240   : > { %s1835_s16 = smov %s1413_s18  ;;  %s1836_s17 = smov %s1839_s22 }
 0x241   : > { %s1837_s18 = smov %s1843_s23  ;;  %15 = sbr.rel (!%p13_p1) target bundleno = 8 (0x8), region = 81 }
 0x246   :  { %834 = vsyncpa [#allocation5], 1 }
 0x247   :  { %836 = vsyncpa [#allocation5 + $0x1], 1 }
 0x248   :  { %837 = vsyncmov [#allocation3] }
 0x24b   :  { %s838_s25 = vpop.sfrf %837 }
 0x24c   :  { %p924_p3 = scmp.ne.s32.totalorder %s838_s25, 0 }
 0x24e   :  { %842 = shalt.err (%p924_p3)  }

</bundles_post_ra>
